<compile_context>
chip_gen: v5e
topology: v5e:2x2
jax: 0.10.0
libtpu: 0.0.40
codegen_flags: <defaults>
</compile_context>

<pallas_src>
import functools

import jax
import jax.numpy as jnp
from jax.experimental import pallas as pl
from jax.experimental.pallas import tpu as pltpu


def _round_up(x, m):
    return ((x + m - 1) // m) * m


# ----------------------------------------------------------------------------
# Kernel
# ----------------------------------------------------------------------------
def _make_actor_kernel(h_pad, a_pad, maxaction, bf16_tanh):
    """Kernel factory closing over padded dims, maxaction and the tanh dtype."""

    def actor_kernel(x_ref, w1_ref, w2_ref, w3_ref, b_ref, o_ref):
        # x arrives f32 with the true (unpadded) state_dim lanes; cast to bf16
        # only for the MXU (cheap VPU op hidden under DMA/MXU).
        x = x_ref[...].astype(jnp.bfloat16)
        b1 = b_ref[0:1, :h_pad]
        b2 = b_ref[1:2, :h_pad]
        b3 = b_ref[2:3, :a_pad]

        def act(pre_f32, is_last):
            if bf16_tanh:
                # v6e/v7x: bf16 EUP path (~2x transcendental throughput) and
                # the result is already bf16 for the next MXU dot.
                t = jnp.tanh(pre_f32.astype(jnp.bfloat16))
            else:
                # v5e: f32 is the fast (and only) EUP path.
                t = jnp.tanh(pre_f32)
            if is_last:
                return t.astype(jnp.float32) * maxaction
            return t.astype(jnp.bfloat16)

        # Layer 1: bf16 MXU matmul, f32 accumulation, bias-add in f32.
        h = jnp.dot(x, w1_ref[...], preferred_element_type=jnp.float32)
        h = act(h + b1, is_last=False)
        # Layer 2
        h = jnp.dot(h, w2_ref[...], preferred_element_type=jnp.float32)
        h = act(h + b2, is_last=False)
        # Layer 3 + maxaction scale
        h = jnp.dot(h, w3_ref[...], preferred_element_type=jnp.float32)
        out = act(h + b3, is_last=True)

        o_ref[...] = out.astype(o_ref.dtype)

    return actor_kernel


# ----------------------------------------------------------------------------
# One-time parameter preparation (hoisted out of the per-call forward)
# ----------------------------------------------------------------------------
def prepare_params(params):
    """Pad + cast the Actor parameters once; returns kernel-ready arrays."""
    S, H = params["w1"].shape
    A = params["w3"].shape[1]
    H_p = _round_up(H, 128)
    A_p = _round_up(A, 128)
    NB = max(H_p, A_p)
    # Packed-bias lanes must cover both hidden and action widths.
    assert NB >= H_p and NB >= A_p

    def pad2d(a, rows, cols):
        return jnp.pad(a, ((0, rows - a.shape[0]), (0, cols - a.shape[1])))

    # w1 keeps the true state_dim on its contraction axis (no lane padding of
    # the state stream); output dims are 128-aligned for the MXU / lane-dense
    # stores.  Zero padding keeps semantics exact: tanh(0)=0 propagates zeros.
    w1 = pad2d(params["w1"], S, H_p).astype(jnp.bfloat16)
    w2 = pad2d(params["w2"], H_p, H_p).astype(jnp.bfloat16)
    w3 = pad2d(params["w3"], H_p, A_p).astype(jnp.bfloat16)

    b_packed = jnp.zeros((3, NB), jnp.float32)
    b_packed = b_packed.at[0, :H].set(params["b1"].reshape(-1))
    b_packed = b_packed.at[1, :H].set(params["b2"].reshape(-1))
    b_packed = b_packed.at[2, :A].set(params["b3"].reshape(-1))

    return dict(w1=w1, w2=w2, w3=w3, b=b_packed)


# ----------------------------------------------------------------------------
# Forward
# ----------------------------------------------------------------------------
def _choose_block_b(B):
    B8 = _round_up(B, 8)
    if B8 <= 8:
        return B8  # tiny batch: single grid step, no extra padding
    # >=2 (even) grid steps so ("parallel",) shards the batch over both
    # TensorCores on v7x; cap tiles at 1024 rows (HBM-roofline sweet spot,
    # ~1-2 MiB of activations per tile at TD3 sizes).
    n_steps = max(2, (B8 + 1023) // 1024)
    if n_steps % 2:
        n_steps += 1
    return _round_up((B + n_steps - 1) // n_steps, 8)


def _default_bf16_tanh():
    # bf16 EUP path exists on v6e / v7x; keep f32 tanh elsewhere (v5e etc.).
    try:
        kind = jax.devices()[0].device_kind.lower()
    except Exception:
        return False
    return ("v6" in kind) or ("v7" in kind)


@functools.partial(
    jax.jit, static_argnames=("action_dim", "maxaction", "block_b", "bf16_tanh"))
def _actor_forward(state, prepared, action_dim, maxaction, block_b, bf16_tanh):
    B, S = state.shape
    H_p = prepared["w1"].shape[1]
    A_p = prepared["w3"].shape[1]
    NB = prepared["b"].shape[1]

    B_p = _round_up(B, block_b)
    x = state if B_p == B else jnp.pad(state, ((0, B_p - B), (0, 0)))

    kernel = _make_actor_kernel(H_p, A_p, float(maxaction), bf16_tanh)

    out_padded = pl.pallas_call(
        kernel,
        out_shape=jax.ShapeDtypeStruct((B_p, A_p), jnp.float32),
        grid=(B_p // block_b,),
        in_specs=[
            # f32 state rows; lane dim = true state_dim (full-extent block).
            pl.BlockSpec((block_b, S), lambda i: (i, 0)),
            # Weights / biases: constant index maps -> DMA'd once, VMEM-resident.
            pl.BlockSpec((S, H_p), lambda i: (0, 0)),
            pl.BlockSpec((H_p, H_p), lambda i: (0, 0)),
            pl.BlockSpec((H_p, A_p), lambda i: (0, 0)),
            pl.BlockSpec((3, NB), lambda i: (0, 0)),
        ],
        out_specs=pl.BlockSpec((block_b, A_p), lambda i: (i, 0)),
        compiler_params=pltpu.CompilerParams(
            dimension_semantics=("parallel",),
            # NOTE: at TD3 sizes VMEM use is ~1-2 MiB; only a much larger
            # net_width would need vmem_limit_bytes / Buffered(1) weights.
        ),
    )(x, prepared["w1"], prepared["w2"], prepared["w3"], prepared["b"])

    return out_padded[:B, :action_dim]


def actor_forward(state, prepared, action_dim, maxaction, block_b=None,
                  bf16_tanh=None):
    """state: [B, state_dim] f32; `prepared` from prepare_params()."""
    if block_b is None:
        block_b = _choose_block_b(state.shape[0])
    if bf16_tanh is None:
        bf16_tanh = _default_bf16_tanh()
    return _actor_forward(state, prepared, int(action_dim), float(maxaction),
                          int(block_b), bool(bf16_tanh))


# ----------------------------------------------------------------------------
# Init + pure-JAX reference
# ----------------------------------------------------------------------------
def init_params(key, state_dim, action_dim, net_width):
    """Deterministic init mirroring nn.Linear ([in, out] weights, [1, out] biases)."""
    ks = jax.random.split(key, 6)

    def lin(kw, kb, fan_in, fan_out):
        bound = 1.0 / float(fan_in) ** 0.5
        w = jax.random.uniform(kw, (fan_in, fan_out), jnp.float32, -bound, bound)
        b = jax.random.uniform(kb, (1, fan_out), jnp.float32, -bound, bound)
        return w, b

    w1, b1 = lin(ks[0], ks[1], state_dim, net_width)
    w2, b2 = lin(ks[2], ks[3], net_width, net_width)
    w3, b3 = lin(ks[4], ks[5], net_width, action_dim)
    return dict(w1=w1, b1=b1, w2=w2, b2=b2, w3=w3, b3=b3)


def actor_ref(state, params, maxaction):
    a = jnp.tanh(state @ params["w1"] + params["b1"])
    a = jnp.tanh(a @ params["w2"] + params["b2"])
    a = jnp.tanh(a @ params["w3"] + params["b3"]) * maxaction
    return a


if __name__ == "__main__":
    key = jax.random.PRNGKey(0)
    B, state_dim, action_dim, net_width = 8, 16, 4, 32
    maxaction = 2.0

    k_state, k_params = jax.random.split(key)
    state = jax.random.normal(k_state, (B, state_dim), dtype=jnp.float32)
    params = init_params(k_params, state_dim, action_dim, net_width)

    prepared = prepare_params(params)  # one-time prep (hoisted out of forward)

    out = actor_forward(state, prepared, action_dim, maxaction)
    out = jax.block_until_ready(out)

    ref = actor_ref(state, params, maxaction)
    assert out.shape == (B, action_dim), out.shape
    # bf16 matmul operands (and bf16 tanh on v6e/v7x) with f32 accumulation ->
    # looser tolerance than pure f32.
    assert jnp.allclose(out, ref, atol=3e-2, rtol=3e-2), (
        "mismatch vs JAX reference: max abs diff "
        f"{float(jnp.max(jnp.abs(out - ref)))}"
    )

    print("KERNEL_OK")
</pallas_src>

<mosaic_0001>
module attributes {stable_mosaic.version = 11 : i64} {
  func.func @actor_kernel(%arg0: i32, %arg1: memref<8x16xf32, #tpu.memory_space<vmem>>, %arg2: memref<16x128xbf16, #tpu.memory_space<vmem>>, %arg3: memref<128x128xbf16, #tpu.memory_space<vmem>>, %arg4: memref<128x128xbf16, #tpu.memory_space<vmem>>, %arg5: memref<3x128xf32, #tpu.memory_space<vmem>>, %arg6: memref<8x128xf32, #tpu.memory_space<vmem>>) attributes {dimension_semantics = [#tpu.dimension_semantics<parallel>], iteration_bounds = array<i64: 1>, scalar_prefetch = 0 : i64, scratch_operands = 0 : i64, tpu.core_type = #tpu.core_type<tc>, window_params = [{transform_indices = @transform_0, window_bounds = array<i64: 8, 16>}, {pipeline_mode = #tpu.pipeline_mode<synchronous>, transform_indices = @transform_1, window_bounds = array<i64: 16, 128>}, {pipeline_mode = #tpu.pipeline_mode<synchronous>, transform_indices = @transform_2, window_bounds = array<i64: 128, 128>}, {pipeline_mode = #tpu.pipeline_mode<synchronous>, transform_indices = @transform_3, window_bounds = array<i64: 128, 128>}, {pipeline_mode = #tpu.pipeline_mode<synchronous>, transform_indices = @transform_4, window_bounds = array<i64: 3, 128>}, {transform_indices = @transform_5, window_bounds = array<i64: 8, 128>}]} {
    %c0 = arith.constant 0 : index
    %c0_0 = arith.constant 0 : index
    %0 = vector.load %arg1[%c0, %c0_0] : memref<8x16xf32, #tpu.memory_space<vmem>>, vector<8x16xf32>
    %1 = arith.truncf %0 : vector<8x16xf32> to vector<8x16xbf16>
    %c0_1 = arith.constant 0 : index
    %c0_2 = arith.constant 0 : index
    %2 = vector.load %arg5[%c0_1, %c0_2] : memref<3x128xf32, #tpu.memory_space<vmem>>, vector<1x128xf32>
    %c1 = arith.constant 1 : index
    %c0_3 = arith.constant 0 : index
    %3 = vector.load %arg5[%c1, %c0_3] : memref<3x128xf32, #tpu.memory_space<vmem>>, vector<1x128xf32>
    %c2 = arith.constant 2 : index
    %c0_4 = arith.constant 0 : index
    %4 = vector.load %arg5[%c2, %c0_4] : memref<3x128xf32, #tpu.memory_space<vmem>>, vector<1x128xf32>
    %c0_5 = arith.constant 0 : index
    %c0_6 = arith.constant 0 : index
    %5 = vector.load %arg2[%c0_5, %c0_6] : memref<16x128xbf16, #tpu.memory_space<vmem>>, vector<16x128xbf16>
    %cst = arith.constant dense<0.000000e+00> : vector<8x128xf32>
    %6 = tpu.matmul %1, %5, %cst {dimension_numbers = #tpu.dot_dimension_numbers<[1], [0], [0], [1], [0, 0, 1, 1], [], []>} : vector<8x16xbf16>, vector<16x128xbf16>, vector<8x128xf32> -> vector<8x128xf32>
    %7 = vector.broadcast %2 : vector<1x128xf32> to vector<8x128xf32>
    %8 = arith.addf %6, %7 : vector<8x128xf32>
    %9 = math.tanh %8 : vector<8x128xf32>
    %10 = arith.truncf %9 : vector<8x128xf32> to vector<8x128xbf16>
    %c0_7 = arith.constant 0 : index
    %c0_8 = arith.constant 0 : index
    %11 = vector.load %arg3[%c0_7, %c0_8] : memref<128x128xbf16, #tpu.memory_space<vmem>>, vector<128x128xbf16>
    %cst_9 = arith.constant dense<0.000000e+00> : vector<8x128xf32>
    %12 = tpu.matmul %10, %11, %cst_9 {dimension_numbers = #tpu.dot_dimension_numbers<[1], [0], [0], [1], [0, 0, 1, 1], [], []>} : vector<8x128xbf16>, vector<128x128xbf16>, vector<8x128xf32> -> vector<8x128xf32>
    %13 = vector.broadcast %3 : vector<1x128xf32> to vector<8x128xf32>
    %14 = arith.addf %12, %13 : vector<8x128xf32>
    %15 = math.tanh %14 : vector<8x128xf32>
    %16 = arith.truncf %15 : vector<8x128xf32> to vector<8x128xbf16>
    %c0_10 = arith.constant 0 : index
    %c0_11 = arith.constant 0 : index
    %17 = vector.load %arg4[%c0_10, %c0_11] : memref<128x128xbf16, #tpu.memory_space<vmem>>, vector<128x128xbf16>
    %cst_12 = arith.constant dense<0.000000e+00> : vector<8x128xf32>
    %18 = tpu.matmul %16, %17, %cst_12 {dimension_numbers = #tpu.dot_dimension_numbers<[1], [0], [0], [1], [0, 0, 1, 1], [], []>} : vector<8x128xbf16>, vector<128x128xbf16>, vector<8x128xf32> -> vector<8x128xf32>
    %19 = vector.broadcast %4 : vector<1x128xf32> to vector<8x128xf32>
    %20 = arith.addf %18, %19 : vector<8x128xf32>
    %21 = math.tanh %20 : vector<8x128xf32>
    %cst_13 = arith.constant 2.000000e+00 : f32
    %22 = vector.broadcast %cst_13 : f32 to vector<8x128xf32>
    %23 = arith.mulf %21, %22 : vector<8x128xf32>
    %c0_14 = arith.constant 0 : index
    %c0_15 = arith.constant 0 : index
    %24 = vector.load %arg6[%c0_14, %c0_15] : memref<8x128xf32, #tpu.memory_space<vmem>>, vector<8x128xf32>
    tpu.vector_store %arg6[%c0_14, %c0_15], %23 {strides = array<i32>} : memref<8x128xf32, #tpu.memory_space<vmem>>, vector<8x128xf32>,
    return
  }
  func.func @transform_0(%arg0: i32) -> (i32, i32) {
    %c0_i32 = arith.constant 0 : i32
    %c0_i32_0 = arith.constant 0 : i32
    return %arg0, %c0_i32 : i32, i32
  }
  func.func @transform_1(%arg0: i32) -> (i32, i32) {
    %c0_i32 = arith.constant 0 : i32
    %c0_i32_0 = arith.constant 0 : i32
    %c0_i32_1 = arith.constant 0 : i32
    return %c0_i32, %c0_i32_0 : i32, i32
  }
  func.func @transform_2(%arg0: i32) -> (i32, i32) {
    %c0_i32 = arith.constant 0 : i32
    %c0_i32_0 = arith.constant 0 : i32
    %c0_i32_1 = arith.constant 0 : i32
    return %c0_i32, %c0_i32_0 : i32, i32
  }
  func.func @transform_3(%arg0: i32) -> (i32, i32) {
    %c0_i32 = arith.constant 0 : i32
    %c0_i32_0 = arith.constant 0 : i32
    %c0_i32_1 = arith.constant 0 : i32
    return %c0_i32, %c0_i32_0 : i32, i32
  }
  func.func @transform_4(%arg0: i32) -> (i32, i32) {
    %c0_i32 = arith.constant 0 : i32
    %c0_i32_0 = arith.constant 0 : i32
    %c0_i32_1 = arith.constant 0 : i32
    return %c0_i32, %c0_i32_0 : i32, i32
  }
  func.func @transform_5(%arg0: i32) -> (i32, i32) {
    %c0_i32 = arith.constant 0 : i32
    %c0_i32_0 = arith.constant 0 : i32
    return %arg0, %c0_i32 : i32, i32
  }
}

</mosaic_0001>

<bundles_post_ra>
// kernel: _actor_forward.1
= control target key start
LH: loop header
LB: loop body
LE: loop exit
PB: predicated region body
PF: predicated region fallthrough
CT: control target
= control target key end

     0   :  { %10 = vsyncpa [#allocation3], 0  ;;  %s579_s0 = inlined_call_operand.hbm [shape: f32[8,16], index: 0, kind: input, shape index: {}]   ;;  %s580_s1 = inlined_call_operand.hbm [shape: bf16[16,128], index: 1, kind: input, shape index: {}]   ;;  %s581_s2 = inlined_call_operand.hbm [shape: bf16[128,128], index: 2, kind: input, shape index: {}]   ;;  %s582_s3 = inlined_call_operand.hbm [shape: bf16[128,128], index: 3, kind: input, shape index: {}]   ;;  %s583_s4 = inlined_call_operand.hbm [shape: f32[3,128], index: 4, kind: input, shape index: {}]   ;;  %s584_s5 = inlined_call_operand.vmem [shape: f32[8,128], index: 5, kind: output, shape index: {}]  }
   0x1   :  { %11 = vsyncpa [#allocation5], 0  ;;  %s28_s20 = sshll.u32 %s580_s1, 4  ;;  %s29_s20 = int_to_ptr.hbm [resolvable:$true] %s28_s20 }
   0x2   :  { %12 = vsyncpa [#allocation8], 0  ;;  %s524_s21 = smov [#allocation4]   ;;  %s54_s25 = sshll.u32 %s582_s3, 4  ;;  %s55_s25 = int_to_ptr.hbm [resolvable:$true] %s54_s25 }
   0x3   :  { %s30_s22 = sshll.u32 %s524_s21, 4  ;;  %s525_s26 = smov 64   ;;  %s31_s22 = int_to_ptr.vmem [resolvable:$true] %s30_s22 }
   0x4   :  { %s526_s27 = smov 4   ;;  %s527_s28 = smov [#allocation7]  }
   0x5   :  { %36 = dma.hbm_to_vmem [thread:$0]  %s29_s20, 128, %s31_s22, [#allocation5], %s525_s26, %s525_s26, %s526_s27  }
   0x6   :  { %s56_s29 = sshll.u32 %s527_s28, 4  ;;  %s18_s7 = sshll.u32 %s579_s0, 4  ;;  %s57_s29 = int_to_ptr.vmem [resolvable:$true] %s56_s29  ;;  %s19_s7 = int_to_ptr.hbm [resolvable:$true] %s18_s7 }
   0x7   :  { %62 = dma.hbm_to_vmem [thread:$0]  %s55_s25, 1024, %s57_s29, [#allocation8], %s525_s26, %s525_s26, %s526_s27  }
   0x8   :  { %s41_s9 = sshll.u32 %s581_s2, 4  ;;  %s528_s10 = smov [#allocation2]   ;;  %s42_s9 = int_to_ptr.hbm [resolvable:$true] %s41_s9 }
   0x9   :  { %s20_s11 = sshll.u32 %s528_s10, 4  ;;  %s529_s3 = smov [#allocation6]   ;;  %s21_s11 = int_to_ptr.vmem [resolvable:$true] %s20_s11 }
   0xa   :  { %23 = dma.hbm_to_vmem [thread:$0]  %s19_s7, 128, %s21_s11, [#allocation3]  }
   0xb   :  { %s43_s12 = sshll.u32 %s529_s3, 4  ;;  %s68_s15 = sshll.u32 %s583_s4, 4  ;;  %s44_s12 = int_to_ptr.vmem [resolvable:$true] %s43_s12  ;;  %s69_s15 = int_to_ptr.hbm [resolvable:$true] %s68_s15 }
   0xc   :  { %49 = dma.hbm_to_vmem [thread:$0]  %s42_s9, 1024, %s44_s12, [#allocation5], %s525_s26, %s525_s26, %s526_s27  }
   0xd   :  { %s530_s0 = smov [#allocation9]  }
   0xe   :  { %s70_s16 = sshll.u32 %s530_s0, 4  ;;  %s71_s16 = int_to_ptr.vmem [resolvable:$true] %s70_s16 }
   0xf   :  { %73 = dma.hbm_to_vmem [thread:$0]  %s69_s15, 64, %s71_s16, [#allocation8]  }
  0x10   :  { %518 = dma.done.wait [#allocation3], 128  }
  0x11   :  { %519 = vsyncadd [#allocation3], 4294967168 }
  0x12   :  { %520 = dma.done.wait [#allocation5], 1152  }
  0x13   :  { %521 = vsyncadd [#allocation5], 4294966144 }
  0x14   :  { %522 = dma.done.wait [#allocation8], 1088  }
  0x15   :  { %523 = vsyncadd [#allocation8], 4294966208  ;;  %v365_v0 = vld [vmem:[#allocation4] sm:$0xff]  ;;  %v95_v1 = vld [vmem:[#allocation2] sm:$0xff]  ;;  %vm109_vm0 = vcmask 130048  }
  0x16   :  { %v373_v2 = vld [vmem:[#allocation6 + $0x38] sm:$0xff]  ;;  %v96_v3 = vpack.c.bf16 %v95_v1, %v95_v1  ;;  %120 = vmatpush.bf16.msra.mxu0 %v365_v0  ;;  %v372_v4 = vld [vmem:[#allocation6 + $0x30] sm:$0xff]  ;;  %v371_v5 = vld [vmem:[#allocation6 + $0x28] sm:$0xff] }
  0x17   :  { %193 = vmatpush.bf16.msra.mxu1 %v373_v2  ;;  %v370_v6 = vld [vmem:[#allocation6 + $0x20] sm:$0xff]  ;;  %v369_v7 = vld [vmem:[#allocation6 + $0x18] sm:$0xff]  ;;  %v368_v8 = vld [vmem:[#allocation6 + $0x10] sm:$0xff] }
  0x18   :  { %v367_v9 = vld [vmem:[#allocation6 + $0x8] sm:$0xff]  ;;  %v366_v10 = vld [vmem:[#allocation6] sm:$0xff]  ;;  %v381_v11 = vld [vmem:[#allocation7 + $0x38] sm:$0xff] }
  0x19   :  { %300 = vmatmul.msk.bf16.vlgmr.msra.gmra.mxu0 %vm109_vm0, %v96_v3  ;;  %273 = vmatpush.bf16.msra.mxu2 %v381_v11  ;;  %v380_v12 = vld [vmem:[#allocation7 + $0x30] sm:$0xff]  ;;  %v379_v13 = vld [vmem:[#allocation7 + $0x28] sm:$0xff]  ;;  %v378_v14 = vld [vmem:[#allocation7 + $0x20] sm:$0xff] }
  0x1a   :  { %v377_v15 = vld [vmem:[#allocation7 + $0x18] sm:$0xff]  ;;  %v389_v16 = vld [vmem:[#allocation9] ss:$0 sm:$0xff]  ;;  %v376_v22 = vld [vmem:[#allocation7 + $0x10] sm:$0xff] }
  0x1b   :  { %194 = vmatpush.bf16.msra.mxu1 %v372_v4  ;;  %v375_v23 = vld [vmem:[#allocation7 + $0x8] sm:$0xff]  ;;  %v374_v24 = vld [vmem:[#allocation7] sm:$0xff] }
  0x1c   :  { %v390_v25 = vld [vmem:[#allocation9 + $0x1] ss:$0 sm:$0xff]  ;;  %v391_v31 = vld [vmem:[#allocation9 + $0x2] ss:$0 sm:$0xff] }
  0x1d   :  { %274 = vmatpush.bf16.msra.mxu2 %v380_v12 }
  0x1f   :  { %195 = vmatpush.bf16.msra.mxu1 %v371_v5 }
  0x21   :  { %275 = vmatpush.bf16.msra.mxu2 %v379_v13 }
  0x23   :  { %196 = vmatpush.bf16.msra.mxu1 %v370_v6 }
  0x25   :  { %276 = vmatpush.bf16.msra.mxu2 %v378_v14 }
  0x27   :  { %197 = vmatpush.bf16.msra.mxu1 %v369_v7 }
  0x29   :  { %277 = vmatpush.bf16.msra.mxu2 %v377_v15 }
  0x2b   :  { %198 = vmatpush.bf16.msra.mxu1 %v368_v8 }
  0x2d   :  { %278 = vmatpush.bf16.msra.mxu2 %v376_v22 }
  0x2f   :  { %199 = vmatpush.bf16.msra.mxu1 %v367_v9 }
  0x31   :  { %279 = vmatpush.bf16.msra.mxu2 %v375_v23 }
  0x33   :  { %200 = vmatpush.bf16.msra.mxu1 %v366_v10 }
  0x35   :  { %280 = vmatpush.bf16.msra.mxu2 %v374_v24 }
  0x96   :  { %v122_v17 = vpop.f32.mrf.mxu0 }
  0x97   :  { %v123_v18 = vadd.f32 %v389_v16, %v122_v17 }
  0x99   :  { %392 = vtanh.f32 %v123_v18 }
  0x9e   :  { %v124_v19 = vpop.f32.mrf.mxu0 }
  0x9f   :  { %v393_v20 = vpop.eup %392 }
  0xa0   :  { %v127_v21 = vpack.c.bf16 %v393_v20, %v393_v20 }
  0xa2   :  { %201 = vmatmul.bf16.vlgmr.msra.gmra.mxu1 %v127_v21 }
 0x11f   :  { %v202_v26 = vpop.f32.mrf.mxu1 }
 0x120   :  { %v203_v27 = vadd.f32 %v390_v25, %v202_v26 }
 0x122   :  { %394 = vtanh.f32 %v203_v27 }
 0x127   :  { %v204_v28 = vpop.f32.mrf.mxu1 }
 0x128   :  { %v395_v29 = vpop.eup %394 }
 0x129   :  { %v207_v30 = vpack.c.bf16 %v395_v29, %v395_v29 }
 0x12b   :  { %281 = vmatmul.bf16.vlgmr.msra.gmra.mxu2 %v207_v30 }
 0x1ae   :  { %v282_v32 = vpop.f32.mrf.mxu2 }
 0x1af   :  { %v283_v33 = vadd.f32 %v391_v31, %v282_v32 }
 0x1b1   :  { %396 = vtanh.f32 %v283_v33 }
 0x1b6   :  { %v284_v34 = vpop.f32.mrf.mxu2 }
 0x1b7   :  { %v397_v35 = vpop.eup %396 }
 0x1b8   :  { %v287_v36 = vmul.f32 2.0, %v397_v35 }
 0x1ba   :  { %288 = vst [vmem:[%s584_s5] sm:$0xff] %v287_v36 }
 0x1bb   :  { %293 = vsyncpa [#allocation3], 1 }
 0x1bc   :  { %294 = vsyncpa [#allocation5], 1 }
 0x1bd   :  { %295 = vsyncpa [#allocation8], 1 }

</bundles_post_ra>
